<compile_context>
chip_gen: v7x
topology: tpu7x:2x2x1
jax: 0.10.0
libtpu: 0.0.40
codegen_flags: <defaults>
</compile_context>

<pallas_src>
import functools
import math

import jax
import jax.numpy as jnp
from jax import lax
from jax.experimental import pallas as pl
from jax.experimental.pallas import tpu as pltpu


def _round_up(x, m):
    return (x + m - 1) // m * m


def _sublayer_connection_kernel(seed_ref, x_ref, a2_ref, b2_ref, w_ref, bias_ref,
                                o_ref, *, dropout_p, keep_threshold, eps,
                                rows_per_tile):
    x = x_ref[...].astype(jnp.float32)                       # (TR, F) f32
    feat = x.shape[-1]

    # --- LayerNorm (torch semantics: unbiased std, eps added to std) ---
    # NOTE: unbiased variance divides by (feat-1) -> NaN/inf for feat==1,
    # exactly like torch.std (intentional parity).
    mean = jnp.mean(x, axis=-1, keepdims=True)
    centered = x - mean
    var_unbiased = jnp.sum(centered * centered, axis=-1, keepdims=True) / (feat - 1)
    # One divide per row (TR total), broadcast-multiplied over F lanes.
    inv_std = 1.0 / (jnp.sqrt(var_unbiased) + eps)
    y = a2_ref[...] * (centered * inv_std) + b2_ref[...]     # (TR, F) f32

    # --- synthetic sublayer: Linear(F -> F); bf16 MXU inputs, f32 accumulate ---
    # (intentional numerics difference vs. torch's f32 nn.Linear)
    z = jnp.dot(y.astype(w_ref.dtype), w_ref[...],
                preferred_element_type=jnp.float32) + bias_ref[...]

    # --- dropout (inverted scaling, like nn.Dropout in training mode) ---
    if dropout_p >= 1.0:
        z = jnp.zeros_like(z)                                 # drop everything
    elif dropout_p > 0.0:
        # Counter-based hash PRNG on the global element index (tiling-invariant,
        # works on HW and in interpret mode).  2-round mix keeps the VALU cost
        # low for small-F (non-MXU-bound) shapes.
        # NOTE: index wraps mod 2^32 -> mask stream repeats only past 4G elements.
        row0 = pl.program_id(0) * rows_per_tile
        r = (lax.broadcasted_iota(jnp.int32, z.shape, 0) + row0).astype(jnp.uint32)
        c = lax.broadcasted_iota(jnp.int32, z.shape, 1).astype(jnp.uint32)
        h = r * jnp.uint32(feat) + c
        h = h ^ seed_ref[0].astype(jnp.uint32)
        h = (h ^ (h >> 16)) * jnp.uint32(0x7FEB352D)
        h = (h ^ (h >> 15)) * jnp.uint32(0x846CA68B)
        keep = h >= jnp.uint32(keep_threshold)                # P(keep) = 1 - p
        z = jnp.where(keep, z * (1.0 / (1.0 - dropout_p)), 0.0)
    # TODO(synk): dropout RNG stream differs from torch's; Bernoulli-keep /
    #             (1-p) scaling semantics match.

    # --- residual add (f32), cast once on store ---
    o_ref[...] = (x + z).astype(o_ref.dtype)


def sublayer_connection(x, a2, b2, w, bias, *, dropout_p=0.0, seed=0, eps=1e-6,
                        row_tile=None, mxu_dtype=jnp.bfloat16):
    """x: (..., F).  a2, b2, bias: (F,).  w: (F, F)."""
    orig_shape = x.shape
    feat = x.shape[-1]
    rows = math.prod(x.shape[:-1])
    x2 = x.reshape(rows, feat)
    x_item = jnp.dtype(x.dtype).itemsize
    w_item = jnp.dtype(mxu_dtype).itemsize

    if row_tile is None:
        # Grow the tile when F is small so each streamed x/out tile is a few
        # MiB (per-grid-step overhead + small-DMA inefficiency otherwise eat
        # 15-35% of HBM roofline), but cap at 1024 rows so the f32 temporaries
        # stay bounded for large F.
        row_bytes = max(feat * x_item, 1)
        row_tile = int(min(1024, max(256, (4 << 20) // row_bytes)))
        # Guarantee the "parallel" row axis gets several grid steps (>= 2, aim
        # for 4) so v7x can shard across its 2 TensorCores and the pipeline
        # actually overlaps DMA with compute.  8-row granularity for (8,128).
        row_tile = min(row_tile, max(8, _round_up(pl.cdiv(rows, 4), 8)))
        row_tile = max(8, _round_up(row_tile, 8))
    grid = pl.cdiv(rows, row_tile)          # ragged boundary block is masked

    a2_2d = a2.reshape(1, feat).astype(jnp.float32)
    b2_2d = b2.reshape(1, feat).astype(jnp.float32)
    bias_2d = bias.reshape(1, feat).astype(jnp.float32)
    w_mxu = w.astype(mxu_dtype)          # halves weight DMA bytes + VMEM residency
    seed_arr = jnp.array([seed], dtype=jnp.int32)

    # Integer dropout threshold: keep iff hash >= p * 2^32.
    keep_threshold = min(int(round(float(dropout_p) * (1 << 32))), (1 << 32) - 1)

    kernel = functools.partial(_sublayer_connection_kernel,
                               dropout_p=float(dropout_p),
                               keep_threshold=keep_threshold,
                               eps=float(eps),
                               rows_per_tile=row_tile)

    # Explicit VMEM budget from tile arithmetic (lane-padded to 128):
    #   double-buffered x/out tiles, SINGLE resident bf16 weight + params,
    #   plus ~6 live f32 in-kernel tile temporaries.  Clamp to this
    #   generation's physical VMEM minus headroom (~56 MiB on v7x).
    feat_l = _round_up(feat, 128)
    tile_elems = row_tile * feat_l
    est = (2 * 2 * tile_elems * x_item        # double-buffered x in + out tiles
           + feat_l * feat_l * w_item         # W: single resident copy
           + 3 * feat_l * 4                   # a_2 / b_2 / bias
           + 6 * tile_elems * 4)              # ~6 live f32 tile temporaries
    try:
        vmem_cap = int(pltpu.get_tpu_info().vmem_capacity_bytes)
    except Exception:
        vmem_cap = 64 * 1024 * 1024           # conservative (v7x per-TC)
    vmem_ceiling = min(vmem_cap - (8 << 20), 100 << 20)
    vmem_limit = int(min(max(int(est * 1.5), 16 << 20), vmem_ceiling))

    out = pl.pallas_call(
        kernel,
        out_shape=jax.ShapeDtypeStruct((rows, feat), x.dtype),
        grid_spec=pltpu.PrefetchScalarGridSpec(
            num_scalar_prefetch=1,
            grid=(grid,),
            in_specs=[
                # x streams through double-buffered row tiles.
                pl.BlockSpec((row_tile, feat), lambda i, seed: (i, 0)),
                # Params + weight: whole-array, single resident VMEM copies
                # (constant across the grid -> no double buffering).
                pl.BlockSpec(memory_space=pltpu.MemorySpace.VMEM),   # a_2
                pl.BlockSpec(memory_space=pltpu.MemorySpace.VMEM),   # b_2
                pl.BlockSpec(memory_space=pltpu.MemorySpace.VMEM),   # W (sublayer)
                pl.BlockSpec(memory_space=pltpu.MemorySpace.VMEM),   # bias (sublayer)
            ],
            out_specs=pl.BlockSpec((row_tile, feat), lambda i, seed: (i, 0)),
        ),
        compiler_params=pltpu.CompilerParams(
            dimension_semantics=("parallel",),        # row tiles are independent
            vmem_limit_bytes=vmem_limit),
    )(seed_arr, x2, a2_2d, b2_2d, w_mxu, bias_2d)

    return out.reshape(orig_shape)


def _reference_no_dropout(x, a2, b2, w, bias, eps=1e-6, mxu_dtype=jnp.bfloat16):
    """Pure-JAX reference of x + sublayer(LayerNorm(x)) (dropout in eval mode),
    with the same bf16 MXU-input cast and LayerNorm op ordering the kernel uses."""
    x32 = x.astype(jnp.float32)
    feat = x.shape[-1]
    mean = jnp.mean(x32, axis=-1, keepdims=True)
    centered = x32 - mean
    var_unbiased = jnp.sum(centered * centered, axis=-1, keepdims=True) / (feat - 1)
    inv_std = 1.0 / (jnp.sqrt(var_unbiased) + eps)
    y = a2 * (centered * inv_std) + b2
    z = jnp.dot(y.astype(mxu_dtype), w.astype(mxu_dtype),
                preferred_element_type=jnp.float32) + bias
    return (x32 + z).astype(x.dtype)


if __name__ == "__main__":
    batch, seq, hidden = 2, 8, 32

    key = jax.random.PRNGKey(0)
    kx, kw, kb, kx2 = jax.random.split(key, 4)

    x = jax.random.normal(kx, (batch, seq, hidden), dtype=jnp.float32)

    # LayerNorm params (torch init: ones / zeros).
    a2 = jnp.ones((hidden,), dtype=jnp.float32)
    b2 = jnp.zeros((hidden,), dtype=jnp.float32)

    # Synthetic deterministic "sublayer" = Linear(hidden, hidden).
    w = jax.random.normal(kw, (hidden, hidden), dtype=jnp.float32) * (1.0 / math.sqrt(hidden))
    bias = jax.random.normal(kb, (hidden,), dtype=jnp.float32) * 0.01

    # 1) Eval-mode path (dropout_p = 0): must match the pure-JAX reference.
    out_eval = jax.block_until_ready(
        sublayer_connection(x, a2, b2, w, bias, dropout_p=0.0))
    ref = _reference_no_dropout(x, a2, b2, w, bias)
    assert out_eval.shape == x.shape
    assert jnp.allclose(out_eval, ref, atol=2e-3, rtol=2e-3), "mismatch vs reference"

    # 2) Ragged row count (3*7=21 rows, not a multiple of the 8-row tile):
    #    exercises the masked boundary block instead of a wrapper jnp.pad.
    xr = jax.random.normal(kx2, (3, 7, hidden), dtype=jnp.float32)
    out_r = jax.block_until_ready(
        sublayer_connection(xr, a2, b2, w, bias, dropout_p=0.0))
    ref_r = _reference_no_dropout(xr, a2, b2, w, bias)
    assert out_r.shape == xr.shape
    assert jnp.allclose(out_r, ref_r, atol=2e-3, rtol=2e-3), "ragged mismatch"

    # 3) Training-mode path (dropout_p = 0.1): exercise the dropout branch.
    out_train = jax.block_until_ready(
        sublayer_connection(x, a2, b2, w, bias, dropout_p=0.1, seed=42))
    assert out_train.shape == x.shape
    assert bool(jnp.all(jnp.isfinite(out_train)))

    # Same seed -> same dropout mask (tiling-invariant counter-based hash).
    out_train2 = jax.block_until_ready(
        sublayer_connection(x, a2, b2, w, bias, dropout_p=0.1, seed=42))
    assert jnp.array_equal(out_train, out_train2)

    print("KERNEL_OK")
</pallas_src>

<mosaic_0001>
module attributes {stable_mosaic.version = 11 : i64} {
  func.func @_sublayer_connection_kernel(%arg0: i32, %arg1: memref<1xi32, #tpu.memory_space<smem>>, %arg2: memref<8x32xf32, #tpu.memory_space<vmem>>, %arg3: memref<1x32xf32, #tpu.memory_space<vmem>>, %arg4: memref<1x32xf32, #tpu.memory_space<vmem>>, %arg5: memref<32x32xbf16, #tpu.memory_space<vmem>>, %arg6: memref<1x32xf32, #tpu.memory_space<vmem>>, %arg7: memref<8x32xf32, #tpu.memory_space<vmem>>) attributes {dimension_semantics = [#tpu.dimension_semantics<parallel>], iteration_bounds = array<i64: 2>, scalar_prefetch = 1 : i64, scratch_operands = 0 : i64, tpu.core_type = #tpu.core_type<tc>, window_params = [{transform_indices = @transform_0, window_bounds = array<i64: 8, 32>}, {pipeline_mode = #tpu.pipeline_mode<synchronous>, transform_indices = @transform_1, window_bounds = array<i64: 1, 32>}, {pipeline_mode = #tpu.pipeline_mode<synchronous>, transform_indices = @transform_2, window_bounds = array<i64: 1, 32>}, {pipeline_mode = #tpu.pipeline_mode<synchronous>, transform_indices = @transform_3, window_bounds = array<i64: 32, 32>}, {pipeline_mode = #tpu.pipeline_mode<synchronous>, transform_indices = @transform_4, window_bounds = array<i64: 1, 32>}, {transform_indices = @transform_5, window_bounds = array<i64: 8, 32>}]} {
    %c0 = arith.constant 0 : index
    %c0_0 = arith.constant 0 : index
    %0 = vector.load %arg2[%c0, %c0_0] : memref<8x32xf32, #tpu.memory_space<vmem>>, vector<8x32xf32>
    %cst = arith.constant dense<0.000000e+00> : vector<8xf32>
    %1 = vector.multi_reduction <add>, %0, %cst [1] : vector<8x32xf32> to vector<8xf32>
    %2 = vector.shape_cast %1 : vector<8xf32> to vector<8x1xf32>
    %cst_1 = arith.constant 3.200000e+01 : f32
    %3 = vector.broadcast %cst_1 : f32 to vector<8x1xf32>
    %4 = arith.divf %2, %3 : vector<8x1xf32>
    %5 = vector.broadcast %4 : vector<8x1xf32> to vector<8x32xf32>
    %6 = arith.subf %0, %5 : vector<8x32xf32>
    %7 = arith.mulf %6, %6 : vector<8x32xf32>
    %cst_2 = arith.constant dense<0.000000e+00> : vector<8xf32>
    %8 = vector.multi_reduction <add>, %7, %cst_2 [1] : vector<8x32xf32> to vector<8xf32>
    %9 = vector.shape_cast %8 : vector<8xf32> to vector<8x1xf32>
    %cst_3 = arith.constant 3.100000e+01 : f32
    %10 = vector.broadcast %cst_3 : f32 to vector<8x1xf32>
    %11 = arith.divf %9, %10 : vector<8x1xf32>
    %12 = math.sqrt %11 : vector<8x1xf32>
    %cst_4 = arith.constant 9.99999997E-7 : f32
    %13 = vector.broadcast %cst_4 : f32 to vector<8x1xf32>
    %14 = arith.addf %12, %13 : vector<8x1xf32>
    %cst_5 = arith.constant 1.000000e+00 : f32
    %15 = vector.broadcast %cst_5 : f32 to vector<8x1xf32>
    %16 = arith.divf %15, %14 : vector<8x1xf32>
    %c0_6 = arith.constant 0 : index
    %c0_7 = arith.constant 0 : index
    %17 = vector.load %arg3[%c0_6, %c0_7] : memref<1x32xf32, #tpu.memory_space<vmem>>, vector<1x32xf32>
    %18 = vector.broadcast %16 : vector<8x1xf32> to vector<8x32xf32>
    %19 = arith.mulf %6, %18 : vector<8x32xf32>
    %20 = vector.broadcast %17 : vector<1x32xf32> to vector<8x32xf32>
    %21 = arith.mulf %20, %19 : vector<8x32xf32>
    %c0_8 = arith.constant 0 : index
    %c0_9 = arith.constant 0 : index
    %22 = vector.load %arg4[%c0_8, %c0_9] : memref<1x32xf32, #tpu.memory_space<vmem>>, vector<1x32xf32>
    %23 = vector.broadcast %22 : vector<1x32xf32> to vector<8x32xf32>
    %24 = arith.addf %21, %23 : vector<8x32xf32>
    %25 = arith.truncf %24 : vector<8x32xf32> to vector<8x32xbf16>
    %c0_10 = arith.constant 0 : index
    %c0_11 = arith.constant 0 : index
    %26 = vector.load %arg5[%c0_10, %c0_11] : memref<32x32xbf16, #tpu.memory_space<vmem>>, vector<32x32xbf16>
    %cst_12 = arith.constant dense<0.000000e+00> : vector<8x32xf32>
    %27 = tpu.matmul %25, %26, %cst_12 {dimension_numbers = #tpu.dot_dimension_numbers<[1], [0], [0], [1], [0, 0, 1, 1], [], []>} : vector<8x32xbf16>, vector<32x32xbf16>, vector<8x32xf32> -> vector<8x32xf32>
    %c0_13 = arith.constant 0 : index
    %c0_14 = arith.constant 0 : index
    %28 = vector.load %arg6[%c0_13, %c0_14] : memref<1x32xf32, #tpu.memory_space<vmem>>, vector<1x32xf32>
    %29 = vector.broadcast %28 : vector<1x32xf32> to vector<8x32xf32>
    %30 = arith.addf %27, %29 : vector<8x32xf32>
    %31 = arith.addf %0, %30 : vector<8x32xf32>
    %c0_15 = arith.constant 0 : index
    %c0_16 = arith.constant 0 : index
    %32 = vector.load %arg7[%c0_15, %c0_16] : memref<8x32xf32, #tpu.memory_space<vmem>>, vector<8x32xf32>
    tpu.vector_store %arg7[%c0_15, %c0_16], %31 {strides = array<i32>} : memref<8x32xf32, #tpu.memory_space<vmem>>, vector<8x32xf32>,
    return
  }
  func.func @transform_0(%arg0: i32, %arg1: memref<1xi32, #tpu.memory_space<smem>>) -> (i32, i32) {
    %c0_i32 = arith.constant 0 : i32
    %c0_i32_0 = arith.constant 0 : i32
    return %arg0, %c0_i32 : i32, i32
  }
  func.func @transform_1(%arg0: i32, %arg1: memref<1xi32, #tpu.memory_space<smem>>) -> (i32, i32) {
    %c0_i32 = arith.constant 0 : i32
    %c0_i32_0 = arith.constant 0 : i32
    %c0_i32_1 = arith.constant 0 : i32
    return %c0_i32, %c0_i32_0 : i32, i32
  }
  func.func @transform_2(%arg0: i32, %arg1: memref<1xi32, #tpu.memory_space<smem>>) -> (i32, i32) {
    %c0_i32 = arith.constant 0 : i32
    %c0_i32_0 = arith.constant 0 : i32
    %c0_i32_1 = arith.constant 0 : i32
    return %c0_i32, %c0_i32_0 : i32, i32
  }
  func.func @transform_3(%arg0: i32, %arg1: memref<1xi32, #tpu.memory_space<smem>>) -> (i32, i32) {
    %c0_i32 = arith.constant 0 : i32
    %c0_i32_0 = arith.constant 0 : i32
    %c0_i32_1 = arith.constant 0 : i32
    return %c0_i32, %c0_i32_0 : i32, i32
  }
  func.func @transform_4(%arg0: i32, %arg1: memref<1xi32, #tpu.memory_space<smem>>) -> (i32, i32) {
    %c0_i32 = arith.constant 0 : i32
    %c0_i32_0 = arith.constant 0 : i32
    %c0_i32_1 = arith.constant 0 : i32
    return %c0_i32, %c0_i32_0 : i32, i32
  }
  func.func @transform_5(%arg0: i32, %arg1: memref<1xi32, #tpu.memory_space<smem>>) -> (i32, i32) {
    %c0_i32 = arith.constant 0 : i32
    %c0_i32_0 = arith.constant 0 : i32
    return %arg0, %c0_i32 : i32, i32
  }
}

</mosaic_0001>

<bundles_post_ra>
// kernel: tpu_custom_call.1
= control target key start
LH: loop header
LB: loop body
LE: loop exit
PB: predicated region body
PF: predicated region fallthrough
CT: control target
= control target key end

     0   :  { %12 = vsyncpa [#allocation5], 0  ;;  %s945_s0 = inlined_call_operand.<no memory space> [shape: s32[1], index: 0, kind: input, shape index: {}]   ;;  %s946_s1 = inlined_call_operand.hbm [shape: f32[16,32], index: 1, kind: input, shape index: {}]   ;;  %s947_s2 = inlined_call_operand.vmem [shape: f32[1,32], index: 2, kind: input, shape index: {}]   ;;  %s948_s3 = inlined_call_operand.vmem [shape: f32[1,32], index: 3, kind: input, shape index: {}]   ;;  %s949_s4 = inlined_call_operand.hbm [shape: bf16[32,32], index: 4, kind: input, shape index: {}]   ;;  %s950_s5 = inlined_call_operand.vmem [shape: f32[1,32], index: 5, kind: input, shape index: {}]   ;;  %s951_s6 = inlined_call_operand.hbm [shape: f32[16,32], index: 6, kind: output, shape index: {}]  }
   0x1   :  { %14 = vsyncpa [#allocation5 + $0x1], 0 }
   0x2   :  { %15 = vsyncpa [#allocation8], 0 }
   0x3   :  { %16 = vsyncpa [#allocation6], 0 }
   0x4   :  { %18 = vsyncpa [#allocation6 + $0x1], 0  ;;  %s732_s0 = smov 0   ;;  %s734_s21 = smov 0  }
   0x5   :  { %s736_s22 = smov 0   ;;  %s738_s23 = smov 0  }
   0x6 LB: > { %s753_s24 = sadd.s32 4294967295, %s688_s23   ;;  %s462_s25 = sadd.s32 4294967294, %s688_s23   ;;  %s688_s23 = sphi %s738_s23, %s971_s23   ;;  %s684_s22 = sphi %s736_s22, %s970_s22   ;;  %s680_s21 = sphi %s734_s21, %s969_s21   ;;  %s676_s0 = sphi %s732_s0, %s968_s0  }
   0x7   : > { %p44_p0 = scmp.ne.s32.totalorder %s680_s21, %s676_s0  ;;  %p952_p1 = scmp.eq.s32.totalorder %s753_s24, 0 }
   0x8   : > { %p158_p3 = scmp.eq.s32.totalorder %s462_s25, 1  ;;  %p463_p5 = scmp.ge.s32.totalorder %s688_s23, 1 }
   0x9   : > { %p762_p4 = por %p952_p1, %p44_p0  ;;  %p165_p7 = scmp.lt.s32.totalorder %s688_s23, 3 }
   0xa   : > { %p767_p6 = por %p158_p3, %p44_p0  ;;  %s690_s29 = smov [#allocation7]  }
   0xb   : > { %s955_s26 = scalar_select %p762_p4, 1, 0 }
   0xc   : > { %s956_s27 = scalar_select %p767_p6, 1, 0 }
   0xd   : > { %p772_p8 = pnand %p463_p5, %p165_p7  ;;  %s183_s30 = sshll.u32 %s690_s29, 4  ;;  %s776_s30 = int_to_ptr.vmem [resolvable:$true] %s183_s30 }
   0xe   : > { %s788_s8 = sadd.s32 1, %s688_s23   ;;  %s31_s9 = sadd.s32 1, %s684_s22 }
   0xf   : > { %s957_s28 = scalar_select %p772_p8, 1, 0 }
  0x10   : > { %p501_p9 = pneg %p772_p8  ;;  %s28_s10 = ssub.s32 %s688_s23, %s788_s8 }
  0x11   : > { %s560_s13 = scalar_lea.hbm %s949_s4, 256 }
  0x12   : > { %p783_p11 = pnand %p501_p9, %p952_p1  ;;  %p561_p12 = scmp.ne.s32.totalorder %s949_s4, %s560_s13 }
  0x13   : > { %p567_p5 = scmp.lt.u32.totalorder %s560_s13, %s949_s4 }
  0x14   : > { %p562_p13 = pneg %p783_p11 }
  0x16   : > { %p563_p0 = pnand %p562_p13, %p561_p12 }
  0x18   : > { %p564_p3 = pneg %p563_p0 }
  0x1a   : > { %p569_p7 = pnand %p567_p5, %p564_p3 }
  0x1c   : > { %572 = shalt.err (!%p569_p7)
}
  0x1d   : > { %s573_s18 = scalar_lea.vmem %s776_s30, 256  ;;  %p581_p2 = scmp.lt.s32.totalorder %s776_s30, %s776_s30 }
  0x1e   : > { %p574_p9 = scmp.ne.s32.totalorder %s776_s30, %s573_s18  ;;  %p582_p6 = scmp.lt.s32.totalorder %s573_s18, %s573_s18 }
  0x20   : > { %p576_p10 = pnand %p574_p9, %p562_p13  ;;  %p583_p4 = por %p582_p6, %p581_p2 }
  0x22   : > { %p577_p1 = pneg %p576_p10 }
  0x24   : > { %p584_p8 = pnand %p583_p4, %p577_p1 }
  0x26   : > { %587 = shalt.err (!%p584_p8)
}
  0x27   : > { %s691_s19 = smov 64   ;;  %s692_s20 = smov 4  }
  0x28   : > { %504 = dma.hbm_to_vmem [thread:$0]  (!%p783_p11), %s949_s4, 256, %s776_s30, [#allocation8], %s691_s19, %s691_s19, %s692_s20  }
  0x29   : > { %p29_p2 = scmp.eq.s32.totalorder %s28_s10, 0  ;;  %p38_p1 = scmp.ne.s32.totalorder %s684_s22, %s680_s21 }
  0x2a   : > { %p39_p4 = scmp.eq.s32.totalorder %s688_s23, 0  ;;  %p514_p6 = scmp.lt.s32.totalorder %s688_s23, 2 }
  0x2b   : > { %s819_s11 = scalar_select %p29_p2, %s684_s22, %s31_s9  }
  0x2c   : > { %p40_p8 = por %p39_p4, %p38_p1  ;;  %p959_p10 = scmp.eq.s32.totalorder %s753_s24, 1 }
  0x2d   : > { %s200_s13 = sand.u32 1, %s684_s22   ;;  %s467_s14 = sshll.u32 %s688_s23, 7 }
  0x2e   : > { %p823_p12 = por %p959_p10, %p38_p1  ;;  %s466_s15 = sshll.u32 %s200_s13, 3 }
  0x2f   : > { %s832_s17 = scalar_lea.hbm %s946_s1, %s467_s14  ;;  %s204_s30 = scalar_lea.vmem [#allocation4], %s466_s15 }
  0x30   : > { %s211_s9 = sshll.u32 %s204_s30, 4  ;;  %p834_p11 = pnand %p514_p6, %p40_p8  ;;  %s838_s9 = int_to_ptr.vmem [resolvable:$true] %s211_s9 }
  0x31   : > { %s201_s18 = scalar_lea.sflag [#allocation5], %s200_s13  ;;  %s588_s19 = scalar_lea.hbm %s832_s17, 128 }
  0x32   : > { %p589_p13 = scmp.ne.s32.totalorder %s832_s17, %s588_s19  ;;  %p590_p0 = pneg %p834_p11 }
  0x33   : > { %s593_s29 = scalar_lea.hbm %s946_s1, 256  ;;  %p594_p7 = scmp.lt.u32.totalorder %s832_s17, %s946_s1 }
  0x34   : > { %p591_p3 = pnand %p590_p0, %p589_p13  ;;  %p595_p9 = scmp.lt.u32.totalorder %s593_s29, %s588_s19 }
  0x35   : > { %p597_p1 = scmp.lt.u32.totalorder %s588_s19, %s832_s17 }
  0x36   : > { %p592_p5 = pneg %p591_p3  ;;  %p596_p2 = por %p595_p9, %p594_p7 }
  0x38   : > { %p598_p4 = por %p597_p1, %p596_p2 }
  0x3a   : > { %p599_p6 = pnand %p598_p4, %p592_p5 }
  0x3c   : > { %602 = shalt.err (!%p599_p6)
}
  0x3d   : > { %s603_s13 = scalar_lea.vmem %s838_s9, 128  ;;  %s693_s7 = smov [#allocation4]  }
  0x3e   : > { %p604_p8 = scmp.ne.s32.totalorder %s838_s9, %s603_s13  ;;  %s608_s16 = sshll.u32 %s693_s7, 4  ;;  %s609_s16 = int_to_ptr.vmem [resolvable:$false] %s608_s16 }
  0x3f   : > { %s610_s30 = scalar_lea.vmem %s609_s16, 256  ;;  %p611_p3 = scmp.lt.s32.totalorder %s838_s9, %s609_s16 }
  0x40   : > { %p606_p10 = pnand %p604_p8, %p590_p0  ;;  %p612_p7 = scmp.lt.s32.totalorder %s610_s30, %s603_s13 }
  0x42   : > { %p607_p13 = pneg %p606_p10  ;;  %p613_p9 = por %p612_p7, %p611_p3 }
  0x44   : > { %p614_p2 = pnand %p613_p9, %p607_p13 }
  0x46   : > { %617 = shalt.err (!%p614_p2)
}
  0x47   : > { %508 = dma.hbm_to_vmem [thread:$0]  (!%p834_p11), %s832_s17, 128, %s838_s9, %s201_s18  }
  0x48   : > { %p962_p5 = scmp.ne.s32.totalorder %s957_s28, 0 }
  0x49   : > { %s868_s19 = sand.u32 (!%p962_p5), 1, %s680_s21   ;;  %p963_p0 = scmp.ne.s32.totalorder (!%p962_p5), %s955_s26, 0 }
  0x4a   : > { %220 = sbr.rel (%p962_p5) target bundleno = 646 (0x286), region = 40  ;;  %s469_s20 = sshll.u32 (!%p962_p5), %s868_s19, 3 }
  0x4b   : > { %s223_s25 = scalar_lea.sflag (!%p962_p5), [#allocation5], %s868_s19  ;;  %s226_s29 = scalar_lea.vmem (!%p962_p5), [#allocation4], %s469_s20 }
  0x51   : > { %663 = dma.done.wait (%p963_p0), %s223_s25, 128  }
  0x52   : > { %665 = vsyncadd (%p963_p0), %s223_s25, 4294967168  ;;  %p964_p11 = scmp.eq.s32.totalorder %s753_s24, 0 }
  0x54   : > { %667 = dma.done.wait (%p964_p11), [#allocation8], 256   ;;  %p965_p1 = pmov %p964_p11 }
  0x55   : > { %vm259_vm0 = vcmask 261120   ;;  %v258_v0 = vld [vmem:[%s226_s29] sm:$0xff]  ;;  %v554_v7 = vld [vmem:[#allocation7] sm:$0xff]   ;;  %v694_v8 = vmov 0.0   ;;  %vm695_vm1 = vmmov 0   ;;  %v555_v9 = vld [vmem:[#allocation7 + $0x8] sm:$0xff]  }
  0x56   : > { %669 = vsyncadd (%p965_p1), [#allocation8], 4294967040  ;;  %v260_v1 = vsel %vm259_vm0, %v258_v0, 0.0  ;;  %485 = vmatprep.subr.bf16.mxu0 %v694_v8  ;;  %489 = vmatprep.mubr.msk.bf16.mxu0 %vm695_vm1, %v694_v8  ;;  %v472_v19 = vld [vmem:[%s947_s2] ss:$0 sm:$0xff]  ;;  %s479_s14 = sshll.u32 %s753_s24, 7 }
  0x57   : > { %261 = vadd.xlane.f32.xlu0 %v260_v1  ;;  %486 = vmatpush3.bf16.msra.mxu0 %v554_v7  ;;  %v473_v21 = vld [vmem:[%s948_s3] ss:$0 sm:$0xff]  ;;  %s256_s15 = scalar_lea.vmem [#allocation9], %s469_s20  ;;  %s900_s30 = scalar_lea.hbm %s951_s6, %s479_s14 }
  0x58   : > { %487 = vmatprep.subr.bf16.mxu0 %v694_v8  ;;  %v474_v25 = vld [vmem:[%s950_s5] ss:$0 sm:$0xff]  ;;  %s382_s13 = sshll.u32 %s256_s15, 4  ;;  %s369_s24 = scalar_lea.sflag [#allocation6], %s868_s19  ;;  %s902_s13 = int_to_ptr.vmem [resolvable:$true] %s382_s13 }
  0x59   : > { %s618_s20 = scalar_lea.vmem %s902_s13, 128  ;;  %s696_s25 = smov [#allocation9]  }
  0x5a   : > { %p619_p4 = scmp.ne.s32.totalorder %s902_s13, %s618_s20  ;;  %s622_s29 = sshll.u32 %s696_s25, 4  ;;  %s623_s29 = int_to_ptr.vmem [resolvable:$false] %s622_s29 }
  0x5b   : > { %488 = vmatpush3.bf16.msra.mxu0 %v555_v9  ;;  %s624_s26 = scalar_lea.vmem %s623_s29, 256  ;;  %p625_p10 = scmp.lt.s32.totalorder %s902_s13, %s623_s29 }
  0x5c   : > { %p620_p6 = pnand %p619_p4, %p823_p12  ;;  %p626_p13 = scmp.lt.s32.totalorder %s624_s26, %s618_s20 }
  0x5e   : > { %p621_p8 = pneg %p620_p6  ;;  %p627_p3 = por %p626_p13, %p625_p10 }
  0x60   : > { %p628_p7 = pnand %p627_p3, %p621_p8 }
  0xe4   : > { %v262_v2 = vpop.xlane.xlu0 %261 }
  0xe5   : > { %v264_v3 = vmul.f32 0.03125, %v262_v2 }
  0xe7   : > { %v265_v4 = vsub.f32 %v258_v0, %v264_v3 }
  0xe9   : > { %v266_v5 = vmul.f32 %v265_v4, %v265_v4 }
  0xeb   : > { %v267_v6 = vsel %vm259_vm0, %v266_v5, 0.0 }
  0xec   : > { %268 = vadd.xlane.f32.xlu0 %v267_v6 }
 0x179   : > { %v269_v10 = vpop.xlane.xlu0 %268 }
 0x17a   : > { %v271_v11 = vmul.f32 0.032258064, %v269_v10 }
 0x17c   : > { %556 = vrsqrt.f32 %v271_v11  ;;  %vm274_vm2 = vcmp.eq.f32.partialorder %v271_v11, inf  ;;  %v277_v14 = vand.u32 2147483648, %v271_v11  ;;  %vm276_vm3 = vcmp.eq.f32.partialorder %v271_v11, 0.0 }
 0x186   : > { %v557_v12 = vpop.eup %556 }
 0x187   : > { %v273_v13 = vmul.f32 %v557_v12, %v271_v11 }
 0x189   : > { %v275_v15 = vsel %vm274_vm2, %v271_v11, %v273_v13 }
 0x18a   : > { %v278_v16 = vsel %vm276_vm3, %v277_v14, %v275_v15 }
 0x18b   : > { %v279_v17 = vadd.f32 1e-06, %v278_v16 }
 0x18d   : > { %558 = vrcp.f32 %v279_v17 }
 0x197   : > { %v559_v18 = vpop.eup %558 }
 0x198   : > { %v283_v20 = vmul.f32 %v559_v18, %v265_v4 }
 0x19a   : > { %v290_v22 = vmul.f32 %v472_v19, %v283_v20 }
 0x19c   : > { %v298_v23 = vadd.f32 %v473_v21, %v290_v22 }
 0x19e   : > { %v299_v24 = vpack.c.bf16 %v298_v23, %v298_v23 }
 0x1a0   : > { %490 = vmatmul.mubr.msk.bf16.vlgmr.msra.gmra.mrb[0].mxu0 %vm259_vm0, %v299_v24 }
 0x273   : > { %v360_v26 = vpop.f32.mrb[0].mxu0 }
 0x274   : > { %v361_v27 = vadd.f32 %v474_v25, %v360_v26  ;;  %v491_v28 = vpop.f32.mrb[1].mxu0 }
 0x275   : > { %v363_v29 = vpop.f32.mrb[2].mxu0 }
 0x276   : > { %v366_v30 = vadd.f32 %v361_v27, %v258_v0  ;;  %v492_v31 = vpop.f32.mrb[3].mxu0 }
 0x278   : > { %367 = vst.msk [vmem:[%s256_s15] sm:$0xff] %vm259_vm0, %v366_v30 }
 0x279   : > { %631 = shalt.err (!%p628_p7)
}
 0x27a   : > { %s632_s19 = scalar_lea.hbm %s900_s30, 128  ;;  %s636_s9 = scalar_lea.hbm %s951_s6, 256 }
 0x27b   : > { %p633_p9 = scmp.ne.s32.totalorder %s900_s30, %s632_s19  ;;  %p637_p0 = scmp.lt.u32.totalorder %s900_s30, %s951_s6 }
 0x27c   : > { %p638_p11 = scmp.lt.u32.totalorder %s636_s9, %s632_s19  ;;  %p640_p4 = scmp.lt.u32.totalorder %s632_s19, %s900_s30 }
 0x27d   : > { %p634_p2 = pnand %p633_p9, %p823_p12 }
 0x27e   : > { %p639_p1 = por %p638_p11, %p637_p0 }
 0x27f   : > { %p635_p5 = pneg %p634_p2 }
 0x280   : > { %p641_p6 = por %p640_p4, %p639_p1 }
 0x282   : > { %p642_p8 = pnand %p641_p6, %p635_p5 }
 0x284   : > { %645 = shalt.err (!%p642_p8)
}
 0x285   : > { %499 = dma.vmem_to_hbm [thread:$0]  (%p823_p12), %s902_s13, 128, %s900_s30, %s369_s24  }
 0x286 PF: > { %s394_s14 = sand.u32 1, %s676_s0   ;;  %p966_p10 = scmp.ne.s32.totalorder %s956_s27, 0 }
 0x287   : > { %p967_p13 = scmp.ge.s32.totalorder %s688_s23, 2  ;;  %s395_s15 = scalar_lea.sflag [#allocation6], %s394_s14 }
 0x289   : > { %p510_p3 = pnand %p967_p13, %p966_p10 }
 0x28b   : > { %671 = dma.done.wait (!%p510_p3), %s395_s15, 128  }
 0x28c   : > { %673 = vsyncadd (!%p510_p3), %s395_s15, 4294967168  ;;  %p21_p7 = scmp.ge.s32.totalorder %s788_s8, 4   ;;  %s968_s0 = smov %s680_s21 }
 0x28d   : > { %s969_s21 = smov %s684_s22  ;;  %s970_s22 = smov %s819_s11 }
 0x28e   : > { %s971_s23 = smov %s788_s8  ;;  %23 = sbr.rel (!%p21_p7) target bundleno = 6 (0x6), region = 89 }
 0x295   :  { %400 = vsyncpa [#allocation5], 1 }
 0x296   :  { %402 = vsyncpa [#allocation5 + $0x1], 1 }
 0x297   :  { %403 = vsyncpa [#allocation8], 1 }
 0x298   :  { %404 = vsyncpa [#allocation6], 1 }
 0x299   :  { %406 = vsyncpa [#allocation6 + $0x1], 1 }

</bundles_post_ra>
